<compile_context>
chip_gen: v6e
topology: v6e:2x2x1
jax: 0.10.0
libtpu: 0.0.40
codegen_flags: <defaults>
</compile_context>

<pallas_src>
import functools

import jax
import jax.numpy as jnp
from jax import lax
from jax.experimental import pallas as pl
from jax.experimental.pallas import tpu as pltpu


# ---------------------------------------------------------------------------
# Fused Pallas kernel: the whole TCN stack for one packed batch chunk.
# Block layout: channels on the sublane axis, (batch-element, time) packed on
# the lane axis as B*L columns.
# ---------------------------------------------------------------------------
def _tcn_kernel(x_ref, *refs, layer_meta, kernel_size, seq_len, compute_dtype):
    """x_ref: (C0, B*L).  refs: per layer (W1, b1, W2, b2[, Wr, br]), then o_ref."""
    o_ref = refs[-1]
    w_refs = refs[:-1]

    BL = x_ref.shape[-1]
    L = seq_len
    K = kernel_size

    # Hoisted once per kernel invocation and reused by every tap of every conv
    # of every layer: per-element time index (lane axis) and one boolean causal
    # mask per distinct shift.  (iota % L) keeps the roll from leaking across
    # packed batch elements.
    t_mod = lax.broadcasted_iota(jnp.int32, (1, BL), 1) % L
    all_shifts = sorted({(K - 1 - k) * d for (d, _) in layer_meta
                         for k in range(K)})
    masks = {s: (t_mod >= s) for s in all_shifts if 0 < s < L}

    def shift_right(v, s):
        # u[:, b*L + t] = v[:, b*L + (t - s)] for t >= s, else 0 (causal pad).
        if s == 0:
            return v
        if s >= L:
            return jnp.zeros_like(v)
        rolled = pltpu.roll(v, shift=s, axis=1)
        return jnp.where(masks[s], rolled, jnp.zeros_like(rolled))

    def causal_conv(vc, w_ref, b_ref, d):
        # vc: (Cin, BL) compute_dtype; w_ref: (K, Cout, Cin); b_ref: (Cout, 1) f32.
        # K dilated taps -> K accumulated MXU matmuls (no sublane concat copy).
        acc = None
        for k in range(K):
            tap = shift_right(vc, (K - 1 - k) * d)
            p = jnp.dot(w_ref[k], tap, preferred_element_type=jnp.float32)
            acc = p if acc is None else acc + p
        return acc + b_ref[...]

    # Elementwise work stays in f32; only MXU operands are narrowed.
    v = x_ref[...].astype(jnp.float32)

    # TODO(synk): for deep stacks with identical per-layer shapes, pack the
    # layer>=1 weights into one stacked array and drive this with lax.fori_loop
    # to bound live ranges / code size (first layer stays unrolled for the
    # Cin / resample special case).
    idx = 0
    for (d, has_resample) in layer_meta:
        w1_ref, b1_ref, w2_ref, b2_ref = w_refs[idx:idx + 4]
        idx += 4
        if has_resample:
            wr_ref, br_ref = w_refs[idx:idx + 2]
            idx += 2

        h = jnp.maximum(causal_conv(v.astype(compute_dtype), w1_ref, b1_ref, d), 0.0)
        # TODO(synk): nn.Dropout is treated as identity (eval-mode semantics).
        h = jnp.maximum(causal_conv(h.astype(compute_dtype), w2_ref, b2_ref, d), 0.0)

        if has_resample:
            res = (jnp.dot(wr_ref[...], v.astype(compute_dtype),
                           preferred_element_type=jnp.float32) + br_ref[...])
        else:
            res = v
        v = jnp.maximum(h + res, 0.0)

    o_ref[...] = v.astype(o_ref.dtype)


# ---------------------------------------------------------------------------
# Wrapper: one pallas_call for the whole stack, NCL in / NCL out.
# ---------------------------------------------------------------------------
def causal_dilation_block_forward(x_ncl, params, kernel_size=2,
                                  compute_dtype=None, batch_block=None):
    """CausalDialationBlock.forward == self.network(x).  x_ncl: (N, C_in, L)."""
    N, C0, L = x_ncl.shape
    K = kernel_size
    if compute_dtype is None:
        compute_dtype = x_ncl.dtype          # f32 in -> f32 MXU operands
    compute_dtype = jnp.dtype(compute_dtype)

    c_last = params[-1]["w1"].shape[0]
    cmax = max([C0] + [p["w1"].shape[0] for p in params])
    itemsize = jnp.dtype(x_ncl.dtype).itemsize

    # ---- generation-aware VMEM budget (75% of physical capacity) ----------
    try:
        vmem_cap = int(pltpu.get_tpu_info().vmem_capacity_bytes)
    except Exception:
        vmem_cap = 64 << 20                   # conservative (v7x-sized) fallback
    vmem_budget = int(vmem_cap * 3 // 4)

    # ---- weight prep: (K, Cout, Cin) per conv, narrowed to compute dtype ----
    layer_meta = []
    w_args = []
    w_specs = []
    for p in params:
        w1, b1, w2, b2, wr, br, d = (p["w1"], p["b1"], p["w2"], p["b2"],
                                     p["wr"], p["br"], p["dilation"])
        cout, cin, _ = w1.shape
        w1t = jnp.transpose(w1, (2, 0, 1)).astype(compute_dtype)   # (K, Cout, Cin)
        w2t = jnp.transpose(w2, (2, 0, 1)).astype(compute_dtype)   # (K, Cout, Cout)
        w_args += [w1t, b1.reshape(cout, 1).astype(jnp.float32),
                   w2t, b2.reshape(cout, 1).astype(jnp.float32)]
        # TODO(synk): single-buffer these constant weight blocks
        # (pipeline_mode=pl.Buffered(1)) once verified on the target JAX
        # version; halves weight VMEM (most valuable inside v7x's 64 MiB).
        w_specs += [
            pl.BlockSpec(w1t.shape, lambda g: (0, 0, 0)),
            pl.BlockSpec((cout, 1), lambda g: (0, 0)),
            pl.BlockSpec(w2t.shape, lambda g: (0, 0, 0)),
            pl.BlockSpec((cout, 1), lambda g: (0, 0)),
        ]
        has_resample = wr is not None
        if has_resample:
            wrf = wr[:, :, 0].astype(compute_dtype)                 # (Cout, Cin)
            w_args += [wrf, br.reshape(cout, 1).astype(jnp.float32)]
            w_specs += [pl.BlockSpec(wrf.shape, lambda g: (0, 0)),
                        pl.BlockSpec((cout, 1), lambda g: (0, 0))]
        layer_meta.append((int(d), bool(has_resample)))

    weight_bytes = sum(int(a.size) * a.dtype.itemsize for a in w_args)

    # ---- pick how many batch elements to pack on the lane axis -------------
    def est_need(b):
        bl = b * L
        io_block = (C0 + c_last) * bl * itemsize          # in + out blocks
        live = (K + 6) * cmax * bl * 4                    # f32 activation temps
        return 2 * (io_block + weight_bytes) + live + (2 << 20)

    if batch_block is None:
        B = max(1, min(N, max(1, 1024 // max(L, 1))))     # target ~1024 lanes
        while B > 1 and est_need(B) > vmem_budget:
            B //= 2
    else:
        B = max(1, min(N, int(batch_block)))
    G = -(-N // B)                                        # cdiv(N, B)
    Np = G * B
    BL = B * L

    # TODO(synk): if est_need(1) > vmem_budget (very long L, esp. on v7x),
    # add a sequential grid axis over L with an L_tile block and carry each
    # layer's (K-1)*d left halo in VMEM scratch across tiles.
    # TODO(synk): when G == 1 on v7x, split the lane axis into 2 chunks and
    # mark that axis "parallel" so both TensorCores get work.
    vmem_limit = int(min(vmem_budget, max(32 << 20, est_need(B))))

    # ---- pack batch along the lane axis: (N, C, L) -> (G, C, B*L) -----------
    if Np != N:
        x_full = jnp.concatenate(
            [x_ncl, jnp.zeros((Np - N, C0, L), x_ncl.dtype)], axis=0)
    else:
        x_full = x_ncl
    x_packed = (x_full.reshape(G, B, C0, L)
                .transpose(0, 2, 1, 3)
                .reshape(G, C0, BL))

    kernel = functools.partial(_tcn_kernel, layer_meta=tuple(layer_meta),
                               kernel_size=K, seq_len=L,
                               compute_dtype=compute_dtype)

    in_specs = [pl.BlockSpec((None, C0, BL), lambda g: (g, 0, 0))] + w_specs

    out = pl.pallas_call(
        kernel,
        out_shape=jax.ShapeDtypeStruct((G, c_last, BL), x_ncl.dtype),
        grid=(G,),
        in_specs=in_specs,
        out_specs=pl.BlockSpec((None, c_last, BL), lambda g: (g, 0, 0)),
        compiler_params=pltpu.CompilerParams(
            dimension_semantics=("parallel",),
            vmem_limit_bytes=vmem_limit,
        ),
    )(x_packed, *w_args)

    # ---- unpack: (G, C_last, B*L) -> (N, C_last, L) -------------------------
    y = (out.reshape(G, c_last, B, L)
         .transpose(0, 2, 1, 3)
         .reshape(Np, c_last, L))
    return y[:N] if Np != N else y


# ---------------------------------------------------------------------------
# Parameter init (matches _Block.init_weights: conv/resample weights = 0.05,
# biases keep the PyTorch default uniform(-1/sqrt(fan_in*k), 1/sqrt(fan_in*k))).
# Weights are stored in the PyTorch Conv1d layout (Cout, Cin, K).
# ---------------------------------------------------------------------------
def init_params(key, num_inputs, num_channels, kernel_size=2):
    params = []
    for i, cout in enumerate(num_channels):
        cin = num_inputs if i == 0 else num_channels[i - 1]
        dilation = 1 if i == 0 else (2 ** i) % 512
        key, k1, k2, k3 = jax.random.split(key, 4)
        w1 = jnp.full((cout, cin, kernel_size), 0.05, jnp.float32)
        w2 = jnp.full((cout, cout, kernel_size), 0.05, jnp.float32)
        bnd1 = 1.0 / (cin * kernel_size) ** 0.5
        bnd2 = 1.0 / (cout * kernel_size) ** 0.5
        b1 = jax.random.uniform(k1, (cout,), jnp.float32, -bnd1, bnd1)
        b2 = jax.random.uniform(k2, (cout,), jnp.float32, -bnd2, bnd2)
        if cin != cout:
            wr = jnp.full((cout, cin, 1), 0.05, jnp.float32)
            bndr = 1.0 / cin ** 0.5
            br = jax.random.uniform(k3, (cout,), jnp.float32, -bndr, bndr)
        else:
            wr = br = None
        params.append(dict(w1=w1, b1=b1, w2=w2, b2=b2, wr=wr, br=br,
                           dilation=dilation))
    return params


# ---------------------------------------------------------------------------
# Pure-JAX reference (lax.conv with exact PyTorch padding/slicing semantics:
# pad (K-1)*d on the left only == pad both sides then drop right).
# ---------------------------------------------------------------------------
def _ref_causal_conv(x_ncl, w, b, d):
    K = w.shape[-1]
    pad = (K - 1) * d
    y = lax.conv_general_dilated(
        x_ncl, w, window_strides=(1,), padding=[(pad, 0)],
        rhs_dilation=(d,), dimension_numbers=("NCH", "OIH", "NCH"))
    return y + b[None, :, None]


def reference_forward(x_ncl, params):
    x = x_ncl
    for p in params:
        h = jax.nn.relu(_ref_causal_conv(x, p["w1"], p["b1"], p["dilation"]))
        h = jax.nn.relu(_ref_causal_conv(h, p["w2"], p["b2"], p["dilation"]))
        res = x if p["wr"] is None else _ref_causal_conv(x, p["wr"], p["br"], 1)
        x = jax.nn.relu(h + res)
    return x


# ---------------------------------------------------------------------------
if __name__ == "__main__":
    num_inputs = 4
    num_channels = [8, 8]          # two levels: dilation 1 then 2
    kernel_size = 2
    N, L = 2, 16

    key = jax.random.PRNGKey(0)
    k_x, k_p = jax.random.split(key)
    x = jax.random.normal(k_x, (N, num_inputs, L), jnp.float32)   # NCL like torch

    params = init_params(k_p, num_inputs, num_channels, kernel_size)
    y_ref = reference_forward(x, params)

    # f32 operand path (default MXU precision, as before).
    y = causal_dilation_block_forward(x, params, kernel_size)
    y = jax.block_until_ready(y)
    assert y.shape == (N, num_channels[-1], L), y.shape
    err = float(jnp.max(jnp.abs(y - y_ref)))
    assert err < 5e-3, f"f32 path max abs error {err}"

    # bf16 operand path (v6e/v7x MXU-throughput / VMEM win), f32 accumulation.
    y_bf = causal_dilation_block_forward(x, params, kernel_size,
                                         compute_dtype=jnp.bfloat16)
    y_bf = jax.block_until_ready(y_bf)
    rel = float(jnp.max(jnp.abs(y_bf - y_ref))) / (float(jnp.max(jnp.abs(y_ref))) + 1e-6)
    assert rel < 0.1, f"bf16 path relative error {rel}"

    print("KERNEL_OK")
</pallas_src>

<mosaic_0001>
module attributes {stable_mosaic.version = 11 : i64} {
  func.func @_tcn_kernel(%arg0: i32, %arg1: memref<1x4x32xf32, #tpu.memory_space<vmem>>, %arg2: memref<2x8x4xf32, #tpu.memory_space<vmem>>, %arg3: memref<8x1xf32, #tpu.memory_space<vmem>>, %arg4: memref<2x8x8xf32, #tpu.memory_space<vmem>>, %arg5: memref<8x1xf32, #tpu.memory_space<vmem>>, %arg6: memref<8x4xf32, #tpu.memory_space<vmem>>, %arg7: memref<8x1xf32, #tpu.memory_space<vmem>>, %arg8: memref<2x8x8xf32, #tpu.memory_space<vmem>>, %arg9: memref<8x1xf32, #tpu.memory_space<vmem>>, %arg10: memref<2x8x8xf32, #tpu.memory_space<vmem>>, %arg11: memref<8x1xf32, #tpu.memory_space<vmem>>, %arg12: memref<1x8x32xf32, #tpu.memory_space<vmem>>) attributes {dimension_semantics = [#tpu.dimension_semantics<parallel>], iteration_bounds = array<i64: 1>, scalar_prefetch = 0 : i64, scratch_operands = 0 : i64, tpu.core_type = #tpu.core_type<tc>, window_params = [{transform_indices = @transform_0, window_bounds = array<i64: 1, 4, 32>}, {pipeline_mode = #tpu.pipeline_mode<synchronous>, transform_indices = @transform_1, window_bounds = array<i64: 2, 8, 4>}, {pipeline_mode = #tpu.pipeline_mode<synchronous>, transform_indices = @transform_2, window_bounds = array<i64: 8, 1>}, {pipeline_mode = #tpu.pipeline_mode<synchronous>, transform_indices = @transform_3, window_bounds = array<i64: 2, 8, 8>}, {pipeline_mode = #tpu.pipeline_mode<synchronous>, transform_indices = @transform_4, window_bounds = array<i64: 8, 1>}, {pipeline_mode = #tpu.pipeline_mode<synchronous>, transform_indices = @transform_5, window_bounds = array<i64: 8, 4>}, {pipeline_mode = #tpu.pipeline_mode<synchronous>, transform_indices = @transform_6, window_bounds = array<i64: 8, 1>}, {pipeline_mode = #tpu.pipeline_mode<synchronous>, transform_indices = @transform_7, window_bounds = array<i64: 2, 8, 8>}, {pipeline_mode = #tpu.pipeline_mode<synchronous>, transform_indices = @transform_8, window_bounds = array<i64: 8, 1>}, {pipeline_mode = #tpu.pipeline_mode<synchronous>, transform_indices = @transform_9, window_bounds = array<i64: 2, 8, 8>}, {pipeline_mode = #tpu.pipeline_mode<synchronous>, transform_indices = @transform_10, window_bounds = array<i64: 8, 1>}, {transform_indices = @transform_11, window_bounds = array<i64: 1, 8, 32>}]} {
    %0 = tpu.iota {dimensions = array<i32: 1>} : vector<1x32xi32>
    %c16_i32 = arith.constant 16 : i32
    %c0_i32 = arith.constant 0 : i32
    %1 = arith.cmpi eq, %c16_i32, %c0_i32 : i32
    %c1_i32 = arith.constant 1 : i32
    %2 = arith.select %1, %c1_i32, %c16_i32 : i32
    %3 = vector.broadcast %2 : i32 to vector<1x32xi32>
    %4 = arith.remsi %0, %3 : vector<1x32xi32>
    %c0_i32_0 = arith.constant 0 : i32
    %5 = vector.broadcast %c0_i32_0 : i32 to vector<1x32xi32>
    %6 = arith.cmpi ne, %4, %5 : vector<1x32xi32>
    %c0_i32_1 = arith.constant 0 : i32
    %7 = vector.broadcast %c0_i32_1 : i32 to vector<1x32xi32>
    %8 = arith.cmpi slt, %4, %7 : vector<1x32xi32>
    %c0_i32_2 = arith.constant 0 : i32
    %9 = arith.cmpi slt, %2, %c0_i32_2 : i32
    %10 = vector.broadcast %9 : i1 to vector<1x32xi1>
    %11 = vector.broadcast %10 : vector<1x32xi1> to vector<1x32xi1>
    %12 = arith.xori %8, %11 : vector<1x32xi1>
    %13 = arith.andi %12, %6 : vector<1x32xi1>
    %14 = vector.broadcast %2 : i32 to vector<1x32xi32>
    %15 = arith.addi %4, %14 : vector<1x32xi32>
    %16 = arith.select %13, %15, %4 : vector<1x32xi1>, vector<1x32xi32>
    %c1_i32_3 = arith.constant 1 : i32
    %17 = vector.broadcast %c1_i32_3 : i32 to vector<1x32xi32>
    %18 = arith.cmpi sge, %16, %17 : vector<1x32xi32>
    %c2_i32 = arith.constant 2 : i32
    %19 = vector.broadcast %c2_i32 : i32 to vector<1x32xi32>
    %20 = arith.cmpi sge, %16, %19 : vector<1x32xi32>
    %c0 = arith.constant 0 : index
    %c0_4 = arith.constant 0 : index
    %c0_5 = arith.constant 0 : index
    %21 = vector.load %arg1[%c0, %c0_4, %c0_5] : memref<1x4x32xf32, #tpu.memory_space<vmem>>, vector<1x4x32xf32>
    %22 = vector.shape_cast %21 : vector<1x4x32xf32> to vector<4x32xf32>
    %c1_i32_6 = arith.constant 1 : i32
    %23 = tpu.dynamic_rotate %22 by %c1_i32_6 dim 1 : vector<4x32xf32>, i32 -> vector<4x32xf32>
    %cst = arith.constant 0.000000e+00 : f32
    %24 = vector.broadcast %cst : f32 to vector<4x32xf32>
    %25 = vector.shape_cast %18 : vector<1x32xi1> to vector<1x32xi1>
    %26 = vector.broadcast %25 : vector<1x32xi1> to vector<4x32xi1>
    %27 = arith.select %26, %23, %24 : vector<4x32xi1>, vector<4x32xf32>
    %c0_7 = arith.constant 0 : index
    %c0_8 = arith.constant 0 : index
    %c0_9 = arith.constant 0 : index
    %28 = vector.load %arg2[%c0_7, %c0_8, %c0_9] : memref<2x8x4xf32, #tpu.memory_space<vmem>>, vector<1x8x4xf32>
    %29 = vector.shape_cast %28 : vector<1x8x4xf32> to vector<8x4xf32>
    %cst_10 = arith.constant dense<0.000000e+00> : vector<8x32xf32>
    %30 = tpu.matmul %29, %27, %cst_10 {dimension_numbers = #tpu.dot_dimension_numbers<[1], [0], [0], [1], [0, 0, 1, 1], [], []>} : vector<8x4xf32>, vector<4x32xf32>, vector<8x32xf32> -> vector<8x32xf32>
    %c1 = arith.constant 1 : index
    %c0_11 = arith.constant 0 : index
    %c0_12 = arith.constant 0 : index
    %31 = vector.load %arg2[%c1, %c0_11, %c0_12] : memref<2x8x4xf32, #tpu.memory_space<vmem>>, vector<1x8x4xf32>
    %32 = vector.shape_cast %31 : vector<1x8x4xf32> to vector<8x4xf32>
    %cst_13 = arith.constant dense<0.000000e+00> : vector<8x32xf32>
    %33 = tpu.matmul %32, %22, %cst_13 {dimension_numbers = #tpu.dot_dimension_numbers<[1], [0], [0], [1], [0, 0, 1, 1], [], []>} : vector<8x4xf32>, vector<4x32xf32>, vector<8x32xf32> -> vector<8x32xf32>
    %34 = arith.addf %30, %33 : vector<8x32xf32>
    %c0_14 = arith.constant 0 : index
    %c0_15 = arith.constant 0 : index
    %35 = vector.load %arg3[%c0_14, %c0_15] : memref<8x1xf32, #tpu.memory_space<vmem>>, vector<8x1xf32>
    %36 = vector.broadcast %35 : vector<8x1xf32> to vector<8x32xf32>
    %37 = arith.addf %34, %36 : vector<8x32xf32>
    %cst_16 = arith.constant 0.000000e+00 : f32
    %38 = vector.broadcast %cst_16 : f32 to vector<8x32xf32>
    %39 = arith.maximumf %37, %38 : vector<8x32xf32>
    %c1_i32_17 = arith.constant 1 : i32
    %40 = tpu.dynamic_rotate %39 by %c1_i32_17 dim 1 : vector<8x32xf32>, i32 -> vector<8x32xf32>
    %cst_18 = arith.constant 0.000000e+00 : f32
    %41 = vector.broadcast %cst_18 : f32 to vector<8x32xf32>
    %42 = vector.shape_cast %18 : vector<1x32xi1> to vector<1x32xi1>
    %43 = vector.broadcast %42 : vector<1x32xi1> to vector<8x32xi1>
    %44 = arith.select %43, %40, %41 : vector<8x32xi1>, vector<8x32xf32>
    %c0_19 = arith.constant 0 : index
    %c0_20 = arith.constant 0 : index
    %c0_21 = arith.constant 0 : index
    %45 = vector.load %arg4[%c0_19, %c0_20, %c0_21] : memref<2x8x8xf32, #tpu.memory_space<vmem>>, vector<1x8x8xf32>
    %46 = vector.shape_cast %45 : vector<1x8x8xf32> to vector<8x8xf32>
    %cst_22 = arith.constant dense<0.000000e+00> : vector<8x32xf32>
    %47 = tpu.matmul %46, %44, %cst_22 {dimension_numbers = #tpu.dot_dimension_numbers<[1], [0], [0], [1], [0, 0, 1, 1], [], []>} : vector<8x8xf32>, vector<8x32xf32>, vector<8x32xf32> -> vector<8x32xf32>
    %c1_23 = arith.constant 1 : index
    %c0_24 = arith.constant 0 : index
    %c0_25 = arith.constant 0 : index
    %48 = vector.load %arg4[%c1_23, %c0_24, %c0_25] : memref<2x8x8xf32, #tpu.memory_space<vmem>>, vector<1x8x8xf32>
    %49 = vector.shape_cast %48 : vector<1x8x8xf32> to vector<8x8xf32>
    %cst_26 = arith.constant dense<0.000000e+00> : vector<8x32xf32>
    %50 = tpu.matmul %49, %39, %cst_26 {dimension_numbers = #tpu.dot_dimension_numbers<[1], [0], [0], [1], [0, 0, 1, 1], [], []>} : vector<8x8xf32>, vector<8x32xf32>, vector<8x32xf32> -> vector<8x32xf32>
    %51 = arith.addf %47, %50 : vector<8x32xf32>
    %c0_27 = arith.constant 0 : index
    %c0_28 = arith.constant 0 : index
    %52 = vector.load %arg5[%c0_27, %c0_28] : memref<8x1xf32, #tpu.memory_space<vmem>>, vector<8x1xf32>
    %53 = vector.broadcast %52 : vector<8x1xf32> to vector<8x32xf32>
    %54 = arith.addf %51, %53 : vector<8x32xf32>
    %cst_29 = arith.constant 0.000000e+00 : f32
    %55 = vector.broadcast %cst_29 : f32 to vector<8x32xf32>
    %56 = arith.maximumf %54, %55 : vector<8x32xf32>
    %c0_30 = arith.constant 0 : index
    %c0_31 = arith.constant 0 : index
    %57 = vector.load %arg6[%c0_30, %c0_31] : memref<8x4xf32, #tpu.memory_space<vmem>>, vector<8x4xf32>
    %cst_32 = arith.constant dense<0.000000e+00> : vector<8x32xf32>
    %58 = tpu.matmul %57, %22, %cst_32 {dimension_numbers = #tpu.dot_dimension_numbers<[1], [0], [0], [1], [0, 0, 1, 1], [], []>} : vector<8x4xf32>, vector<4x32xf32>, vector<8x32xf32> -> vector<8x32xf32>
    %c0_33 = arith.constant 0 : index
    %c0_34 = arith.constant 0 : index
    %59 = vector.load %arg7[%c0_33, %c0_34] : memref<8x1xf32, #tpu.memory_space<vmem>>, vector<8x1xf32>
    %60 = vector.broadcast %59 : vector<8x1xf32> to vector<8x32xf32>
    %61 = arith.addf %58, %60 : vector<8x32xf32>
    %62 = arith.addf %56, %61 : vector<8x32xf32>
    %cst_35 = arith.constant 0.000000e+00 : f32
    %63 = vector.broadcast %cst_35 : f32 to vector<8x32xf32>
    %64 = arith.maximumf %62, %63 : vector<8x32xf32>
    %c2_i32_36 = arith.constant 2 : i32
    %65 = tpu.dynamic_rotate %64 by %c2_i32_36 dim 1 : vector<8x32xf32>, i32 -> vector<8x32xf32>
    %cst_37 = arith.constant 0.000000e+00 : f32
    %66 = vector.broadcast %cst_37 : f32 to vector<8x32xf32>
    %67 = vector.shape_cast %20 : vector<1x32xi1> to vector<1x32xi1>
    %68 = vector.broadcast %67 : vector<1x32xi1> to vector<8x32xi1>
    %69 = arith.select %68, %65, %66 : vector<8x32xi1>, vector<8x32xf32>
    %c0_38 = arith.constant 0 : index
    %c0_39 = arith.constant 0 : index
    %c0_40 = arith.constant 0 : index
    %70 = vector.load %arg8[%c0_38, %c0_39, %c0_40] : memref<2x8x8xf32, #tpu.memory_space<vmem>>, vector<1x8x8xf32>
    %71 = vector.shape_cast %70 : vector<1x8x8xf32> to vector<8x8xf32>
    %cst_41 = arith.constant dense<0.000000e+00> : vector<8x32xf32>
    %72 = tpu.matmul %71, %69, %cst_41 {dimension_numbers = #tpu.dot_dimension_numbers<[1], [0], [0], [1], [0, 0, 1, 1], [], []>} : vector<8x8xf32>, vector<8x32xf32>, vector<8x32xf32> -> vector<8x32xf32>
    %c1_42 = arith.constant 1 : index
    %c0_43 = arith.constant 0 : index
    %c0_44 = arith.constant 0 : index
    %73 = vector.load %arg8[%c1_42, %c0_43, %c0_44] : memref<2x8x8xf32, #tpu.memory_space<vmem>>, vector<1x8x8xf32>
    %74 = vector.shape_cast %73 : vector<1x8x8xf32> to vector<8x8xf32>
    %cst_45 = arith.constant dense<0.000000e+00> : vector<8x32xf32>
    %75 = tpu.matmul %74, %64, %cst_45 {dimension_numbers = #tpu.dot_dimension_numbers<[1], [0], [0], [1], [0, 0, 1, 1], [], []>} : vector<8x8xf32>, vector<8x32xf32>, vector<8x32xf32> -> vector<8x32xf32>
    %76 = arith.addf %72, %75 : vector<8x32xf32>
    %c0_46 = arith.constant 0 : index
    %c0_47 = arith.constant 0 : index
    %77 = vector.load %arg9[%c0_46, %c0_47] : memref<8x1xf32, #tpu.memory_space<vmem>>, vector<8x1xf32>
    %78 = vector.broadcast %77 : vector<8x1xf32> to vector<8x32xf32>
    %79 = arith.addf %76, %78 : vector<8x32xf32>
    %cst_48 = arith.constant 0.000000e+00 : f32
    %80 = vector.broadcast %cst_48 : f32 to vector<8x32xf32>
    %81 = arith.maximumf %79, %80 : vector<8x32xf32>
    %c2_i32_49 = arith.constant 2 : i32
    %82 = tpu.dynamic_rotate %81 by %c2_i32_49 dim 1 : vector<8x32xf32>, i32 -> vector<8x32xf32>
    %cst_50 = arith.constant 0.000000e+00 : f32
    %83 = vector.broadcast %cst_50 : f32 to vector<8x32xf32>
    %84 = vector.shape_cast %20 : vector<1x32xi1> to vector<1x32xi1>
    %85 = vector.broadcast %84 : vector<1x32xi1> to vector<8x32xi1>
    %86 = arith.select %85, %82, %83 : vector<8x32xi1>, vector<8x32xf32>
    %c0_51 = arith.constant 0 : index
    %c0_52 = arith.constant 0 : index
    %c0_53 = arith.constant 0 : index
    %87 = vector.load %arg10[%c0_51, %c0_52, %c0_53] : memref<2x8x8xf32, #tpu.memory_space<vmem>>, vector<1x8x8xf32>
    %88 = vector.shape_cast %87 : vector<1x8x8xf32> to vector<8x8xf32>
    %cst_54 = arith.constant dense<0.000000e+00> : vector<8x32xf32>
    %89 = tpu.matmul %88, %86, %cst_54 {dimension_numbers = #tpu.dot_dimension_numbers<[1], [0], [0], [1], [0, 0, 1, 1], [], []>} : vector<8x8xf32>, vector<8x32xf32>, vector<8x32xf32> -> vector<8x32xf32>
    %c1_55 = arith.constant 1 : index
    %c0_56 = arith.constant 0 : index
    %c0_57 = arith.constant 0 : index
    %90 = vector.load %arg10[%c1_55, %c0_56, %c0_57] : memref<2x8x8xf32, #tpu.memory_space<vmem>>, vector<1x8x8xf32>
    %91 = vector.shape_cast %90 : vector<1x8x8xf32> to vector<8x8xf32>
    %cst_58 = arith.constant dense<0.000000e+00> : vector<8x32xf32>
    %92 = tpu.matmul %91, %81, %cst_58 {dimension_numbers = #tpu.dot_dimension_numbers<[1], [0], [0], [1], [0, 0, 1, 1], [], []>} : vector<8x8xf32>, vector<8x32xf32>, vector<8x32xf32> -> vector<8x32xf32>
    %93 = arith.addf %89, %92 : vector<8x32xf32>
    %c0_59 = arith.constant 0 : index
    %c0_60 = arith.constant 0 : index
    %94 = vector.load %arg11[%c0_59, %c0_60] : memref<8x1xf32, #tpu.memory_space<vmem>>, vector<8x1xf32>
    %95 = vector.broadcast %94 : vector<8x1xf32> to vector<8x32xf32>
    %96 = arith.addf %93, %95 : vector<8x32xf32>
    %cst_61 = arith.constant 0.000000e+00 : f32
    %97 = vector.broadcast %cst_61 : f32 to vector<8x32xf32>
    %98 = arith.maximumf %96, %97 : vector<8x32xf32>
    %99 = arith.addf %98, %64 : vector<8x32xf32>
    %cst_62 = arith.constant 0.000000e+00 : f32
    %100 = vector.broadcast %cst_62 : f32 to vector<8x32xf32>
    %101 = arith.maximumf %99, %100 : vector<8x32xf32>
    %c0_63 = arith.constant 0 : index
    %c0_64 = arith.constant 0 : index
    %c0_65 = arith.constant 0 : index
    %102 = vector.load %arg12[%c0_63, %c0_64, %c0_65] : memref<1x8x32xf32, #tpu.memory_space<vmem>>, vector<1x8x32xf32>
    %103 = vector.shape_cast %102 : vector<1x8x32xf32> to vector<8x32xf32>
    %104 = vector.shape_cast %101 : vector<8x32xf32> to vector<1x8x32xf32>
    tpu.vector_store %arg12[%c0_63, %c0_64, %c0_65], %104 {strides = array<i32>} : memref<1x8x32xf32, #tpu.memory_space<vmem>>, vector<1x8x32xf32>,
    return
  }
  func.func @transform_0(%arg0: i32) -> (i32, i32, i32) {
    %c0_i32 = arith.constant 0 : i32
    %c0_i32_0 = arith.constant 0 : i32
    %c0_i32_1 = arith.constant 0 : i32
    return %arg0, %c0_i32, %c0_i32_0 : i32, i32, i32
  }
  func.func @transform_1(%arg0: i32) -> (i32, i32, i32) {
    %c0_i32 = arith.constant 0 : i32
    %c0_i32_0 = arith.constant 0 : i32
    %c0_i32_1 = arith.constant 0 : i32
    %c0_i32_2 = arith.constant 0 : i32
    return %c0_i32, %c0_i32_0, %c0_i32_1 : i32, i32, i32
  }
  func.func @transform_2(%arg0: i32) -> (i32, i32) {
    %c0_i32 = arith.constant 0 : i32
    %c0_i32_0 = arith.constant 0 : i32
    %c0_i32_1 = arith.constant 0 : i32
    return %c0_i32, %c0_i32_0 : i32, i32
  }
  func.func @transform_3(%arg0: i32) -> (i32, i32, i32) {
    %c0_i32 = arith.constant 0 : i32
    %c0_i32_0 = arith.constant 0 : i32
    %c0_i32_1 = arith.constant 0 : i32
    %c0_i32_2 = arith.constant 0 : i32
    return %c0_i32, %c0_i32_0, %c0_i32_1 : i32, i32, i32
  }
  func.func @transform_4(%arg0: i32) -> (i32, i32) {
    %c0_i32 = arith.constant 0 : i32
    %c0_i32_0 = arith.constant 0 : i32
    %c0_i32_1 = arith.constant 0 : i32
    return %c0_i32, %c0_i32_0 : i32, i32
  }
  func.func @transform_5(%arg0: i32) -> (i32, i32) {
    %c0_i32 = arith.constant 0 : i32
    %c0_i32_0 = arith.constant 0 : i32
    %c0_i32_1 = arith.constant 0 : i32
    return %c0_i32, %c0_i32_0 : i32, i32
  }
  func.func @transform_6(%arg0: i32) -> (i32, i32) {
    %c0_i32 = arith.constant 0 : i32
    %c0_i32_0 = arith.constant 0 : i32
    %c0_i32_1 = arith.constant 0 : i32
    return %c0_i32, %c0_i32_0 : i32, i32
  }
  func.func @transform_7(%arg0: i32) -> (i32, i32, i32) {
    %c0_i32 = arith.constant 0 : i32
    %c0_i32_0 = arith.constant 0 : i32
    %c0_i32_1 = arith.constant 0 : i32
    %c0_i32_2 = arith.constant 0 : i32
    return %c0_i32, %c0_i32_0, %c0_i32_1 : i32, i32, i32
  }
  func.func @transform_8(%arg0: i32) -> (i32, i32) {
    %c0_i32 = arith.constant 0 : i32
    %c0_i32_0 = arith.constant 0 : i32
    %c0_i32_1 = arith.constant 0 : i32
    return %c0_i32, %c0_i32_0 : i32, i32
  }
  func.func @transform_9(%arg0: i32) -> (i32, i32, i32) {
    %c0_i32 = arith.constant 0 : i32
    %c0_i32_0 = arith.constant 0 : i32
    %c0_i32_1 = arith.constant 0 : i32
    %c0_i32_2 = arith.constant 0 : i32
    return %c0_i32, %c0_i32_0, %c0_i32_1 : i32, i32, i32
  }
  func.func @transform_10(%arg0: i32) -> (i32, i32) {
    %c0_i32 = arith.constant 0 : i32
    %c0_i32_0 = arith.constant 0 : i32
    %c0_i32_1 = arith.constant 0 : i32
    return %c0_i32, %c0_i32_0 : i32, i32
  }
  func.func @transform_11(%arg0: i32) -> (i32, i32, i32) {
    %c0_i32 = arith.constant 0 : i32
    %c0_i32_0 = arith.constant 0 : i32
    %c0_i32_1 = arith.constant 0 : i32
    return %arg0, %c0_i32, %c0_i32_0 : i32, i32, i32
  }
}

</mosaic_0001>

<bundles_post_ra>
// kernel: tpu_custom_call.1
= control target key start
LH: loop header
LB: loop body
LE: loop exit
PB: predicated region body
PF: predicated region fallthrough
CT: control target
= control target key end

     0   :  { %s1150_s0 = inlined_call_operand.vmem [shape: f32[1,4,32], index: 0, kind: input, shape index: {}]   ;;  %s1151_s1 = inlined_call_operand.vmem [shape: f32[2,8,4], index: 1, kind: input, shape index: {}]   ;;  %s1152_s2 = inlined_call_operand.vmem [shape: f32[8,1], index: 2, kind: input, shape index: {}]   ;;  %s1153_s3 = inlined_call_operand.vmem [shape: f32[2,8,8], index: 3, kind: input, shape index: {}]   ;;  %s1154_s4 = inlined_call_operand.vmem [shape: f32[8,1], index: 4, kind: input, shape index: {}]   ;;  %s1155_s5 = inlined_call_operand.vmem [shape: f32[8,4], index: 5, kind: input, shape index: {}]   ;;  %s1156_s6 = inlined_call_operand.vmem [shape: f32[8,1], index: 6, kind: input, shape index: {}]   ;;  %s1157_s7 = inlined_call_operand.vmem [shape: f32[2,8,8], index: 7, kind: input, shape index: {}]   ;;  %s1158_s8 = inlined_call_operand.vmem [shape: f32[8,1], index: 8, kind: input, shape index: {}]   ;;  %s1159_s9 = inlined_call_operand.vmem [shape: f32[2,8,8], index: 9, kind: input, shape index: {}]   ;;  %s1160_s10 = inlined_call_operand.vmem [shape: f32[8,1], index: 10, kind: input, shape index: {}]   ;;  %s1161_s11 = inlined_call_operand.hbm [shape: f32[1,8,32], index: 11, kind: output, shape index: {}]  }
   0x1   :  { %v55_v0 = vld [vmem:[%s1150_s0] sm:$0xf] }
   0x2   :  { %16 = vsyncpa [#allocation3], 0  ;;  %s955_s19 = smov 32   ;;  %v956_v1 = vmov 0.0   ;;  %vm957_vm0 = vmmov 0   ;;  %vm56_vm1 = vcmask 1047808   ;;  %v39_v9 = vlaneseq }
   0x3   :  { %57 = vrot.lane.b32.xlu0 %v55_v0, %s955_s19  ;;  %879 = vmatprep.subr.mxu0 %v956_v1  ;;  %vm77_vm2 = vcmask 1043456   ;;  %v842_v4 = vld [vmem:[%s1151_s1 + $0x8] sm:$0xff]  ;;  %vm73_vm3 = vcmask 31744   ;;  %v958_v5 = vmov 0   ;;  %s959_s21 = smov 97   ;;  %v227_v8 = vld [vmem:[%s1152_s2] sm:$0xff] }
   0x4   :  { %881 = vmatprep.mubr.msk.f32.mxu0 %vm957_vm0, %v956_v1  ;;  %884 = vmatprep.subr.mxu1 %v956_v1  ;;  %v1047_v10 = vand.u32 127, %v39_v9  ;;  %v70_v14 = vld [vmem:[%s1151_s1] sm:$0xff]  ;;  %v847_v27 = vld [vmem:[%s1153_s3 + $0x8] sm:$0xff]  ;;  %vm249_vm5 = vcmask 64512   ;;  %s960_s15 = smov 98   ;;  %vm826_vm7 = vcmask 261120  }
   0x5   :  { %886 = vmatprep.mubr.msk.f32.mxu1 %vm957_vm0, %v956_v1  ;;  %880 = vmatpush3.msk.msra.mxu0 %vm77_vm2, %v55_v0  ;;  %v396_v26 = vld [vmem:[%s1154_s4] sm:$0xff]  ;;  %v853_v51 = vld [vmem:[%s1157_s7 + $0x8] sm:$0xff] }
   0x6   :  { %882 = vmatmul.mubr.msk.f32.vlgmr.msra.gmra.mxu0 %vm73_vm3, %v842_v4  ;;  %889 = vmatprep.subr.mxu0 %v956_v1  ;;  %v45_v11 = vand.u32 15, %v1047_v10  ;;  %v404_v28 = vld [vmem:[%s1155_s5] sm:$0xff]  ;;  %v857_v4 = vld [vmem:[%s1159_s9 + $0x8] sm:$0xff] }
   0x7   :  { %891 = vmatprep.mubr.msk.f32.mxu0 %vm957_vm0, %v956_v1  ;;  %931 = vset.pattern.permute.xlu1 %v958_v5  ;;  %v405_v31 = vld [vmem:[%s1156_s6] sm:$0xff] }
   0x8   :  { %932 = vset.pattern.permute.xlu0 %v958_v5  ;;  %vm1052_vm4 = vcmp.ge.s32.totalorder %v45_v11, 1  ;;  %v246_v32 = vld [vmem:[%s1153_s3] sm:$0xff]  ;;  %vm1117_vm6 = vcmp.ge.s32.totalorder %v45_v11, 2 }
   0x9   :  { %v648_v50 = vld [vmem:[%s1158_s8] sm:$0xff] }
   0xa   :  { %v499_v55 = vld [vmem:[%s1157_s7] sm:$0xff] }
  0x75   :  { %v58_v2 = vpop.permute.xlu0 %57 }
  0x76   :  { %v59_v3 = vsel %vm56_vm1, %v58_v2, %v55_v0 }
  0x77   :  { %60 = vrot.lane.b32.xlu0 %v59_v3, %s955_s19 }
  0xc6   :  { %v147_v16 = vpop.f32.mrf.mxu0 }
  0xc8   :  { %v883_v17 = vpop.f32.mrf.mxu0 }
  0xe9   :  { %v61_v6 = vpop.permute.xlu0 %60 }
  0xea   :  { %v62_v7 = vsel %vm56_vm1, %v61_v6, %v55_v0 }
  0xeb   :  { %66 = vrot.lane.b32.xlu1 %v62_v7, %s959_s21  ;;  %v667_v7 = vld [vmem:[%s1159_s9] sm:$0xff] }
  0xef   :  { %230 = vperm.xlu1 %931, %v227_v8  }
 0x15d   :  { %v67_v13 = vpop.permute.xlu1 %66 }
 0x15e   :  { %v69_v15 = vsel %vm1052_vm4, %v67_v13, 0.0 }
 0x15f   :  { %885 = vmatpush3.msk.msra.mxu1 %vm77_vm2, %v69_v15 }
 0x160   :  { %887 = vmatmul.mubr.msk.f32.vlgmr.msra.gmra.mxu1 %vm73_vm3, %v70_v14  ;;  %894 = vmatprep.subr.mxu1 %v956_v1 }
 0x161   :  { %896 = vmatprep.mubr.msk.f32.mxu1 %vm957_vm0, %v956_v1 }
 0x16a   :  { %v231_v19 = vpop.permute.xlu1 %230 }
 0x220   :  { %v223_v18 = vpop.f32.mrf.mxu1 }
 0x221   :  { %v224_v20 = vadd.f32 %v223_v18, %v147_v16 }
 0x222   :  { %v888_v21 = vpop.f32.mrf.mxu1 }
 0x223   :  { %v233_v22 = vadd.f32 %v231_v19, %v224_v20 }
 0x225   :  { %v234_v23 = vmax.f32 %v233_v22, 0.0 }
 0x227   :  { %235 = vrot.lane.b32.xlu0 %v234_v23, %s955_s19  ;;  %890 = vmatpush3.msra.mxu0 %v234_v23 }
 0x228   :  { %899 = vmatprep.subr.mxu0 %v956_v1  ;;  %892 = vmatmul.mubr.msk.f32.vlgmr.msra.gmra.mxu0 %vm249_vm5, %v847_v27 }
 0x229   :  { %900 = vmatpush3.msk.msra.mxu0 %vm77_vm2, %v55_v0  ;;  %901 = vmatprep.mubr.msk.f32.mxu0 %vm957_vm0, %v956_v1 }
 0x22a   :  { %909 = vmatprep.subr.mxu0 %v956_v1 }
 0x22c   :  { %902 = vmatmul.mubr.msk.f32.vlgmr.msra.gmra.mxu0 %vm73_vm3, %v404_v28 }
 0x22d   :  { %911 = vmatprep.mubr.msk.f32.mxu0 %vm957_vm0, %v956_v1 }
 0x299   :  { %v236_v24 = vpop.permute.xlu0 %235 }
 0x29a   :  { %v237_v25 = vsel %vm56_vm1, %v236_v24, %v234_v23 }
 0x29b   :  { %238 = vrot.lane.b32.xlu1 %v237_v25, %s955_s19 }
 0x29f   :  { %399 = vperm.xlu1 %931, %v396_v26  }
 0x2e8   :  { %v319_v34 = vpop.f32.mrf.mxu0 }
 0x2ea   :  { %v893_v35 = vpop.f32.mrf.mxu0 }
 0x2ec   :  { %v480_v36 = vpop.f32.mrf.mxu0 }
 0x2ee   :  { %v903_v37 = vpop.f32.mrf.mxu0 }
 0x30d   :  { %v239_v29 = vpop.permute.xlu1 %238 }
 0x30e   :  { %v240_v30 = vsel %vm56_vm1, %v239_v29, %v234_v23 }
 0x30f   :  { %242 = vrot.lane.b32.xlu0 %v240_v30, %s959_s21 }
 0x313   :  { %408 = vperm.xlu0 %932, %v405_v31  }
 0x31a   :  { %v400_v41 = vpop.permute.xlu1 %399 }
 0x381   :  { %v243_v33 = vpop.permute.xlu0 %242 }
 0x382   :  { %895 = vmatpush3.msk.msra.mxu1 %vm1052_vm4, %v243_v33 }
 0x383   :  { %897 = vmatmul.mubr.msk.f32.vlgmr.msra.gmra.mxu1 %vm249_vm5, %v246_v32  ;;  %904 = vmatprep.subr.mxu1 %v956_v1 }
 0x384   :  { %906 = vmatprep.mubr.msk.f32.mxu1 %vm957_vm0, %v956_v1 }
 0x38e   :  { %v409_v39 = vpop.permute.xlu0 %408 }
 0x38f   :  { %v481_v44 = vadd.f32 %v480_v36, %v409_v39 }
 0x443   :  { %v392_v38 = vpop.f32.mrf.mxu1 }
 0x444   :  { %v393_v40 = vadd.f32 %v392_v38, %v319_v34 }
 0x445   :  { %v898_v42 = vpop.f32.mrf.mxu1 }
 0x446   :  { %v402_v43 = vadd.f32 %v400_v41, %v393_v40 }
 0x448   :  { %v403_v45 = vmax.f32 %v402_v43, 0.0 }
 0x44a   :  { %v484_v46 = vadd.f32 %v481_v44, %v403_v45 }
 0x44c   :  { %v485_v47 = vmax.f32 %v484_v46, 0.0 }
 0x44e   :  { %486 = vrot.lane.b32.xlu1 %v485_v47, %s955_s19  ;;  %905 = vmatpush3.msra.mxu1 %v485_v47 }
 0x44f   :  { %914 = vmatprep.subr.mxu1 %v956_v1  ;;  %907 = vmatmul.mubr.msk.f32.vlgmr.msra.gmra.mxu1 %vm249_vm5, %v853_v51 }
 0x450   :  { %916 = vmatprep.mubr.msk.f32.mxu1 %vm957_vm0, %v956_v1 }
 0x4c0   :  { %v487_v48 = vpop.permute.xlu1 %486 }
 0x4c1   :  { %v488_v49 = vsel %vm56_vm1, %v487_v48, %v485_v47 }
 0x4c2   :  { %489 = vrot.lane.b32.xlu1 %v488_v49, %s955_s19 }
 0x4c6   :  { %651 = vperm.xlu1 %931, %v648_v50  }
 0x50f   :  { %v571_v57 = vpop.f32.mrf.mxu1 }
 0x511   :  { %v908_v58 = vpop.f32.mrf.mxu1 }
 0x534   :  { %v490_v52 = vpop.permute.xlu1 %489 }
 0x535   :  { %v491_v53 = vsel %vm56_vm1, %v490_v52, %v485_v47 }
 0x536   :  { %495 = vrot.lane.b32.xlu0 %v491_v53, %s960_s15 }
 0x541   :  { %v652_v61 = vpop.permute.xlu1 %651 }
 0x5a8   :  { %v496_v56 = vpop.permute.xlu0 %495 }
 0x5a9   :  { %910 = vmatpush3.msk.msra.mxu0 %vm1117_vm6, %v496_v56 }
 0x5aa   :  { %912 = vmatmul.mubr.msk.f32.vlgmr.msra.gmra.mxu0 %vm249_vm5, %v499_v55  ;;  %919 = vmatprep.subr.mxu0 %v956_v1 }
 0x5ab   :  { %921 = vmatprep.mubr.msk.f32.mxu0 %vm957_vm0, %v956_v1  ;;  %v816_v1 = vld [vmem:[%s1160_s10] sm:$0xff]  ;;  %s961_s10 = smov [#allocation2]  }
 0x66a   :  { %v644_v59 = vpop.f32.mrf.mxu0 }
 0x66b   :  { %v645_v60 = vadd.f32 %v644_v59, %v571_v57 }
 0x66c   :  { %v913_v62 = vpop.f32.mrf.mxu0 }
 0x66d   :  { %v654_v63 = vadd.f32 %v652_v61, %v645_v60 }
 0x66f   :  { %v655_v0 = vmax.f32 %v654_v63, 0.0 }
 0x671   :  { %656 = vrot.lane.b32.xlu0 %v655_v0, %s955_s19  ;;  %915 = vmatpush3.msra.mxu1 %v655_v0 }
 0x672   :  { %917 = vmatmul.mubr.msk.f32.vlgmr.msra.gmra.mxu1 %vm249_vm5, %v857_v4 }
 0x6e3   :  { %v657_v2 = vpop.permute.xlu0 %656 }
 0x6e4   :  { %v658_v3 = vsel %vm56_vm1, %v657_v2, %v655_v0 }
 0x6e5   :  { %659 = vrot.lane.b32.xlu1 %v658_v3, %s955_s19  ;;  %s834_s19 = sshll.u32 %s961_s10, 4  ;;  %s835_s19 = int_to_ptr.vmem [resolvable:$true] %s834_s19 }
 0x6e6   :  { %s933_s9 = scalar_lea.vmem %s835_s19, 128  ;;  %p938_p1 = scmp.lt.s32.totalorder %s835_s19, %s835_s19 }
 0x6e7   :  { %p934_p0 = scmp.ne.s32.totalorder %s835_s19, %s933_s9  ;;  %p939_p2 = scmp.lt.s32.totalorder %s933_s9, %s933_s9 }
 0x6e9   :  { %819 = vperm.xlu1 %931, %v816_v1   ;;  %p940_p3 = por %p939_p2, %p938_p1 }
 0x6eb   :  { %p941_p4 = pnand %p940_p3, %p934_p0 }
 0x732   :  { %v739_v9 = vpop.f32.mrf.mxu1 }
 0x734   :  { %v918_v10 = vpop.f32.mrf.mxu1 }
 0x757   :  { %v660_v5 = vpop.permute.xlu1 %659 }
 0x758   :  { %v661_v6 = vsel %vm56_vm1, %v660_v5, %v655_v0 }
 0x759   :  { %663 = vrot.lane.b32.xlu0 %v661_v6, %s960_s15 }
 0x764   :  { %v820_v13 = vpop.permute.xlu1 %819 }
 0x7cb   :  { %v664_v8 = vpop.permute.xlu0 %663 }
 0x7cc   :  { %920 = vmatpush3.msk.msra.mxu0 %vm1117_vm6, %v664_v8 }
 0x7cd   :  { %922 = vmatmul.mubr.msk.f32.vlgmr.msra.gmra.mxu0 %vm249_vm5, %v667_v7 }
 0x88d   :  { %v812_v11 = vpop.f32.mrf.mxu0 }
 0x88e   :  { %v813_v12 = vadd.f32 %v812_v11, %v739_v9 }
 0x88f   :  { %v923_v14 = vpop.f32.mrf.mxu0 }
 0x890   :  { %v822_v15 = vadd.f32 %v820_v13, %v813_v12 }
 0x892   :  { %v823_v16 = vmax.f32 %v822_v15, 0.0 }
 0x894   :  { %v824_v17 = vadd.f32 %v823_v16, %v485_v47 }
 0x896   :  { %v825_v18 = vmax.f32 %v824_v17, 0.0 }
 0x898   :  { %827 = vst.msk [vmem:[#allocation2] sm:$0xff] %vm826_vm7, %v825_v18 }
 0x899   :  { %944 = shalt.err (!%p941_p4)
}
 0x89a   :  { %837 = dma.vmem_to_hbm [thread:$0]  %s835_s19, 128, %s1161_s11, [#allocation3]  }
 0x89b   :  { %953 = dma.done.wait [#allocation3], 128  }
 0x89c   :  { %954 = vsyncadd [#allocation3], 4294967168 }
 0x89d   :  { %841 = vsyncpa [#allocation3], 1 }

</bundles_post_ra>
